<compile_context>
chip_gen: v5e
topology: v5e:2x2
jax: 0.10.0
libtpu: 0.0.40
codegen_flags: <defaults>
</compile_context>

<pallas_src>
import jax
import jax.numpy as jnp
from jax.experimental import pallas as pl
from jax.experimental.pallas import tpu as pltpu


# --------------------------------------------------------------------------
# Kernel: nonzero mask of (x * w) over a lane-dense (tb, lanes) tile.
# --------------------------------------------------------------------------
def _mask_kernel(x_ref, w_ref, o_ref):
    # x_ref: (tb, lanes) f32 in VMEM
    # w_ref: (1, 1)      f32 in SMEM  (the single weight scalar, pre-cast)
    # o_ref: (tb, lanes) bool (preferred) or int8 in VMEM
    w = w_ref[0, 0]                                  # scalar read from SMEM
    # Single VPU multiply + compare; predicate stored directly (no select,
    # no f32->s8 fptosi).  .astype is a no-op when o_ref is bool.
    o_ref[...] = ((x_ref[...] * w) != 0.0).astype(o_ref.dtype)


def _mask_call(rows, lanes, tb, out_dtype):
    grid = (rows // tb,)
    return pl.pallas_call(
        _mask_kernel,
        out_shape=jax.ShapeDtypeStruct((rows, lanes), out_dtype),
        grid=grid,
        in_specs=[
            pl.BlockSpec((tb, lanes), lambda i: (i, 0)),
            pl.BlockSpec(memory_space=pltpu.MemorySpace.SMEM),
        ],
        out_specs=pl.BlockSpec((tb, lanes), lambda i: (i, 0)),
        compiler_params=pltpu.CompilerParams(
            # Row axis is embarrassingly parallel -> lets v7x's two TCs split it.
            dimension_semantics=("parallel",),
            # <= 32 MiB scoped VMEM: legal headroom on every generation
            # (v7x has only 64 MiB physical VMEM).
            vmem_limit_bytes=32 * 1024 * 1024,
        ),
    )


# ~1M elements per tile: 4 MiB f32 in + 1 MiB mask out, double-buffered
# -> ~10 MiB, comfortably under the 32 MiB scoped-VMEM limit on all chips.
_TARGET_TILE_ELEMS = 1 << 20


def _choose_tiling(total):
    """Pick a lane-dense (rows, lanes, tb) factorization of `total` elements."""
    for lanes in (1024, 512, 256, 128):          # lane-dense trailing dim
        if total % lanes:
            continue
        rows = total // lanes
        max_tb = max(8, min(rows, _TARGET_TILE_ELEMS // lanes))
        if rows <= max_tb:
            return rows, lanes, rows             # single full-array block
        # Prefer multiples of 32 so the 1-byte output block matches its
        # native (32, 128) packing; 16/8 only as a last resort.
        for tb in (2048, 1024, 512, 256, 128, 64, 32, 16, 8):
            if tb <= max_tb and rows % tb == 0:
                return rows, lanes, tb
    return None                                  # not lane-dense-able


_bool_out_supported = True   # flipped to False if Mosaic rejects a bool output ref


def _pallas_mask(x2, w32, rows, lanes, tb):
    """Run the kernel, preferring a fused bool output (no extra cast pass)."""
    global _bool_out_supported
    if _bool_out_supported:
        try:
            return _mask_call(rows, lanes, tb, jnp.bool_)(x2, w32)
        except Exception:
            _bool_out_supported = False
    # Fallback only if this Mosaic build rejects bool-typed output refs:
    # int8 mask + one cast pass (still correct, slightly more HBM traffic).
    return _mask_call(rows, lanes, tb, jnp.int8)(x2, w32).astype(jnp.bool_)


# --------------------------------------------------------------------------
# Wrapper: linear([[1.0]]) -> permute(0,2,1) -> bool
# --------------------------------------------------------------------------
def model_forward(x0, weight, *, force_pallas=False):
    # x0: (B, M, K) float32 with K == 1; weight: (N, K) fp16 with N == K == 1
    B, M, K = x0.shape
    N, Kw = weight.shape
    if not (K == 1 and N == 1 and Kw == 1):
        raise ValueError("Model contract is in_features == out_features == 1")

    w32 = weight.astype(jnp.float32)      # cast fp16 weight ONCE, outside the kernel
    total = B * M
    tiling = _choose_tiling(total)

    # Size-threshold dispatch: for tiny or ragged inputs plain XLA fuses the
    # multiply/compare/reshape into a single pass; Pallas launch overhead
    # (~0.35 us/step + custom-call cost) would dominate.
    if tiling is None or (total < 64 * 1024 and not force_pallas):
        y = x0.reshape(B, M) * w32[0, 0]
        return (y != 0.0).reshape(B, N, M)        # bool, N == 1 axis is free

    rows, lanes, tb = tiling
    x2 = x0.reshape(rows, lanes)          # free metadata reshape (contiguous, K == 1)
    mask = _pallas_mask(x2, w32, rows, lanes, tb)
    # permute(0,2,1) with N == 1 is just inserting a size-1 axis: a free
    # metadata reshape, no data movement, no extra dtype-cast pass.
    return mask.reshape(B, N, M)


if __name__ == "__main__":
    key = jax.random.PRNGKey(0)
    # The forward implies in_features == 1 (weight [[1.0]]): x0 = (B, M, 1).
    # M = 256 keeps the kernel's trailing dim lane-dense (multiple of 128).
    B, M = 2, 256
    x0 = jax.random.normal(key, (B, M, 1), dtype=jnp.float32)
    x0 = x0.at[0, :7, 0].set(0.0)         # make sure both bool values appear
    weight = jnp.array([[1.0]], dtype=jnp.float16)

    # force_pallas=True so the Pallas kernel is exercised even at demo size.
    out = jax.block_until_ready(model_forward(x0, weight, force_pallas=True))

    # pure-JAX reference check
    ref = jnp.transpose(
        jnp.einsum("bmk,nk->bmn", x0, weight.astype(jnp.float32)), (0, 2, 1)
    ) != 0.0
    assert out.shape == (B, 1, M), out.shape
    assert out.dtype == jnp.bool_, out.dtype
    assert bool(jnp.all(out == ref)), "mismatch vs reference"

    # Also exercise the small-size (pure-XLA) dispatch path.
    x_small = jax.random.normal(jax.random.PRNGKey(0), (2, 2, 1), dtype=jnp.float32)
    out_small = jax.block_until_ready(model_forward(x_small, weight))
    assert out_small.shape == (2, 1, 2) and out_small.dtype == jnp.bool_

    print("KERNEL_OK")
</pallas_src>

<mosaic_0001>
module attributes {stable_mosaic.version = 11 : i64} {
  func.func @_mask_kernel(%arg0: i32, %arg1: memref<1x512xf32, #tpu.memory_space<vmem>>, %arg2: memref<1x1xf32, #tpu.memory_space<smem>>, %arg3: memref<1x512xi32, #tpu.memory_space<vmem>>) attributes {dimension_semantics = [#tpu.dimension_semantics<parallel>], iteration_bounds = array<i64: 1>, scalar_prefetch = 0 : i64, scratch_operands = 0 : i64, tpu.core_type = #tpu.core_type<tc>, window_params = [{transform_indices = @transform_0, window_bounds = array<i64: 1, 512>}, {transform_indices = @transform_1, window_bounds = array<i64: 1, 1>}, {transform_indices = @transform_2, window_bounds = array<i64: 1, 512>}]} {
    %c0 = arith.constant 0 : index
    %c0_0 = arith.constant 0 : index
    %0 = memref.load %arg2[%c0, %c0_0] : memref<1x1xf32, #tpu.memory_space<smem>>
    %c0_1 = arith.constant 0 : index
    %c0_2 = arith.constant 0 : index
    %1 = vector.load %arg1[%c0_1, %c0_2] : memref<1x512xf32, #tpu.memory_space<vmem>>, vector<1x512xf32>
    %2 = vector.broadcast %0 : f32 to vector<1x512xf32>
    %3 = arith.mulf %1, %2 : vector<1x512xf32>
    %cst = arith.constant 0.000000e+00 : f32
    %4 = vector.broadcast %cst : f32 to vector<1x512xf32>
    %5 = arith.cmpf one, %3, %4 : vector<1x512xf32>
    %c0_3 = arith.constant 0 : index
    %c0_4 = arith.constant 0 : index
    %6 = vector.load %arg3[%c0_3, %c0_4] : memref<1x512xi32, #tpu.memory_space<vmem>>, vector<1x512xi32>
    %7 = arith.extui %5 : vector<1x512xi1> to vector<1x512xi32>
    %cst_5 = arith.constant dense<0> : vector<1x512xi32>
    %8 = arith.cmpi ne, %6, %cst_5 : vector<1x512xi32>
    tpu.vector_store %arg3[%c0_3, %c0_4], %7 {strides = array<i32>} : memref<1x512xi32, #tpu.memory_space<vmem>>, vector<1x512xi32>,
    return
  }
  func.func @transform_0(%arg0: i32) -> (i32, i32) {
    %c0_i32 = arith.constant 0 : i32
    %c0_i32_0 = arith.constant 0 : i32
    return %arg0, %c0_i32 : i32, i32
  }
  func.func @transform_1(%arg0: i32) -> (i32, i32) {
    %c0_i32 = arith.constant 0 : i32
    %c0_i32_0 = arith.constant 0 : i32
    %c0_i32_1 = arith.constant 0 : i32
    return %c0_i32, %c0_i32_0 : i32, i32
  }
  func.func @transform_2(%arg0: i32) -> (i32, i32) {
    %c0_i32 = arith.constant 0 : i32
    %c0_i32_0 = arith.constant 0 : i32
    return %arg0, %c0_i32 : i32, i32
  }
}

module attributes {stable_mosaic.version = 11 : i64} {
  func.func @_mask_kernel(%arg0: i32, %arg1: memref<1x512xf32, #tpu.memory_space<vmem>>, %arg2: memref<1x1xf32, #tpu.memory_space<smem>>, %arg3: memref<1x512xi8, #tpu.memory_space<vmem>>) attributes {dimension_semantics = [#tpu.dimension_semantics<parallel>], iteration_bounds = array<i64: 1>, scalar_prefetch = 0 : i64, scratch_operands = 0 : i64, tpu.core_type = #tpu.core_type<tc>, window_params = [{transform_indices = @transform_0, window_bounds = array<i64: 1, 512>}, {transform_indices = @transform_1, window_bounds = array<i64: 1, 1>}, {transform_indices = @transform_2, window_bounds = array<i64: 1, 512>}]} {
    %c0 = arith.constant 0 : index
    %c0_0 = arith.constant 0 : index
    %0 = memref.load %arg2[%c0, %c0_0] : memref<1x1xf32, #tpu.memory_space<smem>>
    %c0_1 = arith.constant 0 : index
    %c0_2 = arith.constant 0 : index
    %1 = vector.load %arg1[%c0_1, %c0_2] : memref<1x512xf32, #tpu.memory_space<vmem>>, vector<1x512xf32>
    %2 = vector.broadcast %0 : f32 to vector<1x512xf32>
    %3 = arith.mulf %1, %2 : vector<1x512xf32>
    %cst = arith.constant 0.000000e+00 : f32
    %4 = vector.broadcast %cst : f32 to vector<1x512xf32>
    %5 = arith.cmpf one, %3, %4 : vector<1x512xf32>
    %6 = arith.extui %5 : vector<1x512xi1> to vector<1x512xi8>
    %c0_3 = arith.constant 0 : index
    %c0_4 = arith.constant 0 : index
    %7 = vector.load %arg3[%c0_3, %c0_4] : memref<1x512xi8, #tpu.memory_space<vmem>>, vector<1x512xi8>
    tpu.vector_store %arg3[%c0_3, %c0_4], %6 {strides = array<i32>} : memref<1x512xi8, #tpu.memory_space<vmem>>, vector<1x512xi8>,
    return
  }
  func.func @transform_0(%arg0: i32) -> (i32, i32) {
    %c0_i32 = arith.constant 0 : i32
    %c0_i32_0 = arith.constant 0 : i32
    return %arg0, %c0_i32 : i32, i32
  }
  func.func @transform_1(%arg0: i32) -> (i32, i32) {
    %c0_i32 = arith.constant 0 : i32
    %c0_i32_0 = arith.constant 0 : i32
    %c0_i32_1 = arith.constant 0 : i32
    return %c0_i32, %c0_i32_0 : i32, i32
  }
  func.func @transform_2(%arg0: i32) -> (i32, i32) {
    %c0_i32 = arith.constant 0 : i32
    %c0_i32_0 = arith.constant 0 : i32
    return %arg0, %c0_i32 : i32, i32
  }
}

</mosaic_0001>

<bundles_post_ra>
// kernel: tpu_custom_call.1
= control target key start
LH: loop header
LB: loop body
LE: loop exit
PB: predicated region body
PF: predicated region fallthrough
CT: control target
= control target key end

     0   :  { %8 = vsyncpa [#allocation4], 0  ;;  %s70_s12 = smov [#allocation3]   ;;  %s96_s0 = inlined_call_operand.hbm [shape: f32[1,512], index: 0, kind: input, shape index: {}]   ;;  %s97_s1 = inlined_call_operand.<no memory space> [shape: f32[1,1], index: 1, kind: input, shape index: {}]   ;;  %s98_s2 = inlined_call_operand.vmem [shape: s32[1,512], index: 2, kind: output, shape index: {}]  }
   0x1   :  { %s14_s11 = sshll.u32 %s96_s0, 4  ;;  %s16_s13 = sshll.u32 %s70_s12, 4  ;;  %s15_s11 = int_to_ptr.hbm [resolvable:$true] %s14_s11  ;;  %s17_s13 = int_to_ptr.vmem [resolvable:$true] %s16_s13 }
   0x2   :  { %19 = dma.hbm_to_vmem [thread:$0]  %s15_s11, 64, %s17_s13, [#allocation4]  }
   0x3   :  { %68 = dma.done.wait [#allocation4], 64  }
   0x4   :  { %69 = vsyncadd [#allocation4], 4294967232  ;;  %v28_v0 = vstv %s97_s1  ;;  %v32_v1 = vlaneseq  ;;  %v27_v2 = vld [vmem:[#allocation3] sm:$0xf]  ;;  %v71_v4 = vmov 0  }
   0x5   :  { %v29_v3 = vmul.f32 %v28_v0, %v27_v2 }
   0x6   :  { %vm34_vm0 = vcmp.lt.s32.totalorder %v32_v1, 512 }
   0x7   :  { %vm30_vm1 = vcmp.ne.f32.partialorder %v29_v3, 0.0 }
   0x8   :  { %v31_v5 = vsel %vm30_vm1, 1, %v71_v4 }
   0x9   :  { %36 = vst.msk [vmem:[%s98_s2] sm:$0xf] %vm34_vm0, %v31_v5 }
   0xa   :  { %41 = vsyncpa [#allocation4], 1 }

// kernel: tpu_custom_call.1
= control target key start
LH: loop header
LB: loop body
LE: loop exit
PB: predicated region body
PF: predicated region fallthrough
CT: control target
= control target key end

     0   :  { %8 = vsyncpa [#allocation4], 0  ;;  %s232_s0 = inlined_call_operand.hbm [shape: f32[1,512], index: 0, kind: input, shape index: {}]   ;;  %s233_s1 = inlined_call_operand.<no memory space> [shape: f32[1,1], index: 1, kind: input, shape index: {}]   ;;  %s234_s2 = inlined_call_operand.hbm [shape: s8[1,512], index: 2, kind: output, shape index: {}]  }
   0x1   :  { %9 = vsyncpa [#allocation5], 0  ;;  %s15_s11 = sshll.u32 %s232_s0, 4  ;;  %s175_s12 = smov [#allocation3]   ;;  %s16_s11 = int_to_ptr.hbm [resolvable:$true] %s15_s11 }
   0x2   :  { %s17_s13 = sshll.u32 %s175_s12, 4  ;;  %s18_s13 = int_to_ptr.vmem [resolvable:$true] %s17_s13 }
   0x3   :  { %20 = dma.hbm_to_vmem [thread:$0]  %s16_s11, 64, %s18_s13, [#allocation4]  }
   0x4   :  { %171 = dma.done.wait [#allocation4], 64  }
   0x5   :  { %172 = vsyncadd [#allocation4], 4294967232  ;;  %v176_v0 = vmov 286326784   ;;  %v177_v2 = vmov 858989090   ;;  %v31_v4 = vstv %s233_s1  ;;  %v178_v9 = vmov 0  }
   0x6   :  { %v36_v1 = vunpack.c.l.s4 %v176_v0  ;;  %v40_v3 = vunpack.c.l.s4 %v177_v2  ;;  %v30_v5 = vld [vmem:[#allocation3] sm:$0xf]  ;;  %vm72_vm3 = vcmask 1040384   ;;  %vm84_vm4 = vsmask.f32 0  ;;  %s179_s0 = smov [#allocation6]  }
   0x7   :  { %v32_v6 = vmul.f32 %v31_v4, %v30_v5  ;;  %vm86_vm6 = vcmask 1041409   ;;  %vm87_vm7 = vsmask.f32 1024  ;;  %vm202_vm8 = vmand %vm72_vm3, %vm84_vm4  ;;  %vm76_vm10 = vcmask 1042434   ;;  %s106_s1 = sshll.u32 %s179_s0, 4  ;;  %s108_s18 = sshll.u32 %s234_s2, 4  ;;  %s107_s1 = int_to_ptr.vmem [resolvable:$true] %s106_s1  ;;  %s109_s18 = int_to_ptr.hbm [resolvable:$true] %s108_s18 }
   0x8   :  { %v37_v7 = vunpack.c.0.s8 %v36_v1  ;;  %v41_v8 = vunpack.c.0.s8 %v40_v3  ;;  %vm206_vm9 = vmand %vm86_vm6, %vm87_vm7  ;;  %vm91_vm11 = vsmask.f32 2048  ;;  %vm94_vm14 = vcmask 1043459   ;;  %v98_v34 = vld [vmem:[#allocation6] sm:$0xf] }
   0x9   :  { %vm33_vm0 = vcmp.ne.f32.partialorder %v32_v6, 0.0  ;;  %vm89_vm12 = vmor %vm206_vm9, %vm202_vm8  ;;  %vm95_vm15 = vsmask.f32 3072  ;;  %vm80_vm7 = vcmask 1041408  }
   0xa   :  { %v34_v10 = vsel %vm33_vm0, 1, %v178_v9  ;;  %vm92_vm13 = vmand %vm76_vm10, %vm91_vm11 }
   0xb   :  { %v38_v11 = vperm.slane %v34_v10, %v37_v7  ;;  %v42_v12 = vperm.slane %v34_v10, %v41_v8  ;;  %vm215_vm4 = vmor %vm92_vm13, %vm89_vm12 }
   0xc   :  { %vm219_vm6 = vmand %vm94_vm14, %vm95_vm15 }
   0xd   :  { %vm43_vm1 = vcmp.ne.s32.totalorder %v38_v11, 0  ;;  %vm44_vm2 = vcmp.ne.s32.totalorder %v42_v12, 0  ;;  %vm97_vm8 = vmor %vm219_vm6, %vm215_vm4 }
   0xe   :  { %v45_v13 = vsel %vm43_vm1, 1, %v178_v9  ;;  %v46_v14 = vsel %vm44_vm2, 1, %v178_v9 }
   0xf   :  { %v47_v15 = vpack.c.b16 %v46_v14, %v45_v13 }
  0x11   :  { %v48_v16 = vpack.c.b8 %v47_v15, %v47_v15 }
  0x13   :  { %vm49_vm5 = vnez %v48_v16 }
  0x14   :  { %v50_v17 = vsel %vm49_vm5, 16843009, %v178_v9 }
  0x15   :  { %52 = vst [vmem:[#allocation1] ss:$9 sm:$0xff] %v50_v17 }
  0x1c   :  { %v53_v20 = vld [vmem:[#allocation1] sm:$0xff]  ;;  %v55_v21 = vld [vmem:[#allocation1 + $0x9] sm:$0xff]  ;;  %v57_v22 = vld [vmem:[#allocation1 + $0x12] sm:$0xff] }
  0x1d   :  { %v59_v23 = vld [vmem:[#allocation1 + $0x1b] sm:$0xff]  ;;  %vm61_vm0 = vnez %v53_v20  ;;  %vm62_vm1 = vnez %v55_v21  ;;  %vm63_vm2 = vnez %v57_v22 }
  0x1e   :  { %vm64_vm5 = vnez %v59_v23  ;;  %v66_v25 = vsel %vm62_vm1, 16843009, %v178_v9  ;;  %v67_v26 = vsel %vm63_vm2, 16843009, %v178_v9  ;;  %v65_v31 = vsel %vm61_vm0, 16843009, %v178_v9 }
  0x1f   :  { %v68_v28 = vsel %vm64_vm5, 16843009, %v178_v9  ;;  %v69_v29 = vrot.slane %v66_v25, 7  ;;  %v70_v30 = vrot.slane %v67_v26, 6 }
  0x20   :  { %v71_v32 = vrot.slane %v68_v28, 5 }
  0x21   :  { %v75_v33 = vsel %vm72_vm3, %v65_v31, %v69_v29 }
  0x22   :  { %v79_v35 = vsel %vm76_vm10, %v70_v30, %v71_v32 }
  0x23   :  { %v81_v36 = vsel %vm80_vm7, %v75_v33, %v79_v35 }
  0x24   :  { %v99_v37 = vsel %vm97_vm8, %v81_v36, %v98_v34 }
  0x25   :  { %100 = vst [vmem:[#allocation6] sm:$0xf] %v99_v37 }
  0x26   :  { %111 = dma.vmem_to_hbm [thread:$0]  %s107_s1, 64, %s109_s18, [#allocation5]  }
  0x27   :  { %173 = dma.done.wait [#allocation5], 64  }
  0x28   :  { %174 = vsyncadd [#allocation5], 4294967232 }
  0x29   :  { %116 = vsyncpa [#allocation4], 1 }
  0x2a   :  { %117 = vsyncpa [#allocation5], 1 }

</bundles_post_ra>
